<compile_context>
chip_gen: v6e
topology: v6e:2x2x1
jax: 0.10.0
libtpu: 0.0.40
codegen_flags: <defaults>
</compile_context>

<pallas_src>
import jax
import jax.numpy as jnp
from jax import lax
from jax.experimental import pallas as pl
from jax.experimental.pallas import tpu as pltpu

EPS = 1e-8  # torch.nn.CosineSimilarity default eps


def decoder_kernel(a_ref, b_ref, w_ref, bias_ref, o_ref):
    # a_ref, b_ref : (tm, D_in)    current row tile of the two inputs
    # w_ref        : (D_out, D_in) Linear weight (resident, constant index map)
    # bias_ref     : (D_out, 1)    Linear bias as a column (f32)
    # o_ref        : (1, 1, tm)    lane-dense cosine similarity for this tile
    w = w_ref[...]
    bias = bias_ref[...]  # (D_out, 1)

    # Contract the last dim of both operands: (D_out, D_in) x (tm, D_in)^T
    #   -> (D_out, tm).  Rows of the tile land on lanes of the result.
    dn = (((1,), (1,)), ((), ()))
    ha = lax.dot_general(w, a_ref[...], dn,
                         preferred_element_type=jnp.float32) + bias
    hb = lax.dot_general(w, b_ref[...], dn,
                         preferred_element_type=jnp.float32) + bias

    # Per-row reductions over the feature (sublane) axis -> lane-dense (1, tm).
    dot = jnp.sum(ha * hb, axis=0, keepdims=True)
    na2 = jnp.sum(ha * ha, axis=0, keepdims=True)
    nb2 = jnp.sum(hb * hb, axis=0, keepdims=True)

    # cos = dot / sqrt(max(|ha|^2 * |hb|^2, eps^2))  (single EUP rsqrt)
    inv = lax.rsqrt(jnp.maximum(na2 * nb2, EPS * EPS))
    o_ref[...] = (dot * inv)[None]  # (1, 1, tm)


def _round_up(x, m):
    return ((x + m - 1) // m) * m


def _vmem_limits():
    """(vmem_limit_bytes, physical_capacity_bytes), generation-aware."""
    try:
        cap = int(pltpu.get_tpu_info().vmem_capacity_bytes)
    except Exception:
        cap = 64 << 20  # v7x-safe fallback if the query is unavailable
    limit = max(32 << 20, min(cap - (16 << 20), 100 << 20))
    return limit, cap


def _choose_tile_rows(M, D_in, D_out, in_itemsize, vmem_budget,
                      weight_resident_bytes, n_in_buffers):
    """Row tile from a pad-aware VMEM footprint; keep >=4 grid steps if possible."""
    d_in_pad = _round_up(D_in, 128)         # lane padding of (tm, D_in) blocks
    d_out_pad = _round_up(D_out, 8)         # sublane padding of f32 intermediates
    per_row = (2 * n_in_buffers * d_in_pad * in_itemsize   # a + b tiles, n-deep
               + 4 * d_out_pad * 4)                        # f32 (D_out, tm) temps
    budget = vmem_budget - weight_resident_bytes - (4 << 20)   # headroom
    tm = max(8, budget // max(per_row, 1))
    tm = min(tm, 16384)
    # >= 4 grid steps (2 per v7x TensorCore) when M allows it, so the pipeline
    # actually overlaps prefetch/writeback with compute.
    if tm * 4 > M:
        tm = max(8, _round_up(-(-M // 4), 8))
    return max(8, (tm // 8) * 8)


def decoder_forward(a, b, weight, bias, *, tm=None, compute_dtype=None):
    """a, b: (B, N, D_in); weight: (D_out, D_in); bias: (D_out,) -> (B, N)."""
    B, N, D_in = a.shape
    D_out = weight.shape[0]
    M = B * N

    in_dtype = jnp.dtype(compute_dtype) if compute_dtype is not None \
        else jnp.promote_types(a.dtype, b.dtype)
    in_itemsize = jnp.dtype(in_dtype).itemsize

    # Free, contiguous reshapes -- NO padding copy.  The last grid step is a
    # partial block; its garbage rows only reach output lanes >= M, which are
    # sliced off below.
    a2 = a.reshape(M, D_in).astype(in_dtype)
    b2 = b.reshape(M, D_in).astype(in_dtype)
    w = weight.astype(in_dtype)
    bias_col = bias.reshape(D_out, 1).astype(jnp.float32)

    vmem_limit, vmem_cap = _vmem_limits()
    big_vmem = vmem_cap > (96 << 20)            # v5e/v6e (128 MiB); not v7x (64 MiB)
    sublane_mult = max(1, (8 * 4) // in_itemsize)
    w_resident = (_round_up(D_out, sublane_mult)
                  * _round_up(D_in, 128) * in_itemsize)

    if tm is None:
        tm = _choose_tile_rows(M, D_in, D_out, in_itemsize, vmem_limit,
                               w_resident, 3 if big_vmem else 2)

    grid = pl.cdiv(M, tm)
    deep_input_buffers = big_vmem and grid >= 4

    cost = pl.CostEstimate(
        flops=4 * M * D_in * D_out + 8 * M * D_out,
        transcendentals=M,
        bytes_accessed=(2 * M * D_in * in_itemsize + M * 4
                        + (D_out * D_in + D_out) * in_itemsize),
    )

    # TODO(synk): when D_in << 128, repacking inputs into lane-dense 128-wide
    # blocks (block-diagonal weight) would improve DMA/vreg utilization further.
    def build(use_pipeline_modes):
        in_kw = ({"pipeline_mode": pl.Buffered(3)}
                 if (use_pipeline_modes and deep_input_buffers) else {})
        const_kw = ({"pipeline_mode": pl.Buffered(1)}
                    if use_pipeline_modes else {})
        return pl.pallas_call(
            decoder_kernel,
            out_shape=jax.ShapeDtypeStruct((grid, 1, tm), jnp.float32),
            grid_spec=pltpu.PrefetchScalarGridSpec(
                num_scalar_prefetch=0,
                grid=(grid,),
                in_specs=[
                    pl.BlockSpec((tm, D_in), lambda i: (i, 0), **in_kw),
                    pl.BlockSpec((tm, D_in), lambda i: (i, 0), **in_kw),
                    pl.BlockSpec((D_out, D_in), lambda i: (0, 0), **const_kw),
                    pl.BlockSpec((D_out, 1), lambda i: (0, 0), **const_kw),
                ],
                out_specs=pl.BlockSpec((1, 1, tm), lambda i: (i, 0, 0)),
            ),
            compiler_params=pltpu.CompilerParams(
                dimension_semantics=("parallel",),
                vmem_limit_bytes=vmem_limit,
            ),
            cost_estimate=cost,
        )

    try:
        out = build(True)(a2, b2, w, bias_col)
    except Exception:
        # Fallback for jax versions where BlockSpec(pipeline_mode=...) /
        # pl.Buffered are not supported on this path.
        out = build(False)(a2, b2, w, bias_col)

    return out.reshape(grid * tm)[:M].reshape(B, N)


def reference_forward(a, b, weight, bias):
    ha = jnp.einsum("bnd,od->bno", a, weight) + bias
    hb = jnp.einsum("bnd,od->bno", b, weight) + bias
    dot = jnp.sum(ha * hb, axis=2)
    na2 = jnp.sum(ha * ha, axis=2)
    nb2 = jnp.sum(hb * hb, axis=2)
    # torch cosine_similarity: dot / sqrt(clamp(|x1|^2 * |x2|^2, eps^2))
    return dot / jnp.sqrt(jnp.maximum(na2 * nb2, EPS * EPS))


if __name__ == "__main__":
    # Small shapes: batch=2, nodes=8, input_dim=32, output_dim=32
    B, N, D_in, D_out = 2, 8, 32, 32
    key = jax.random.PRNGKey(0)
    k_a, k_b, k_w, k_bias = jax.random.split(key, 4)

    a = jax.random.normal(k_a, (B, N, D_in), dtype=jnp.float32)
    b = jax.random.normal(k_b, (B, N, D_in), dtype=jnp.float32)

    # Deterministic Linear parameter init (uniform, like nn.Linear's default)
    bound = 1.0 / (D_in ** 0.5)
    weight = jax.random.uniform(k_w, (D_out, D_in), minval=-bound, maxval=bound,
                                dtype=jnp.float32)
    bias = jax.random.uniform(k_bias, (D_out,), minval=-bound, maxval=bound,
                              dtype=jnp.float32)

    out = decoder_forward(a, b, weight, bias)
    out = jax.block_until_ready(out)

    ref = reference_forward(a, b, weight, bias)
    assert out.shape == (B, N)
    assert jnp.allclose(out, ref, atol=1e-5, rtol=1e-5), "mismatch vs reference"

    print("KERNEL_OK")
</pallas_src>

<mosaic_0001>
module attributes {stable_mosaic.version = 11 : i64} {
  func.func @decoder_kernel(%arg0: i32, %arg1: memref<8x32xf32, #tpu.memory_space<vmem>>, %arg2: memref<8x32xf32, #tpu.memory_space<vmem>>, %arg3: memref<32x32xf32, #tpu.memory_space<vmem>>, %arg4: memref<32x1xf32, #tpu.memory_space<vmem>>, %arg5: memref<1x1x8xf32, #tpu.memory_space<vmem>>) attributes {dimension_semantics = [#tpu.dimension_semantics<parallel>], iteration_bounds = array<i64: 2>, scalar_prefetch = 0 : i64, scratch_operands = 0 : i64, tpu.core_type = #tpu.core_type<tc>, window_params = [{transform_indices = @transform_0, window_bounds = array<i64: 8, 32>}, {transform_indices = @transform_1, window_bounds = array<i64: 8, 32>}, {pipeline_mode = #tpu.pipeline_mode<synchronous>, transform_indices = @transform_2, window_bounds = array<i64: 32, 32>}, {pipeline_mode = #tpu.pipeline_mode<synchronous>, transform_indices = @transform_3, window_bounds = array<i64: 32, 1>}, {transform_indices = @transform_4, window_bounds = array<i64: 1, 1, 8>}]} {
    %c0 = arith.constant 0 : index
    %c0_0 = arith.constant 0 : index
    %0 = vector.load %arg3[%c0, %c0_0] : memref<32x32xf32, #tpu.memory_space<vmem>>, vector<32x32xf32>
    %c0_1 = arith.constant 0 : index
    %c0_2 = arith.constant 0 : index
    %1 = vector.load %arg4[%c0_1, %c0_2] : memref<32x1xf32, #tpu.memory_space<vmem>>, vector<32x1xf32>
    %c0_3 = arith.constant 0 : index
    %c0_4 = arith.constant 0 : index
    %2 = vector.load %arg1[%c0_3, %c0_4] : memref<8x32xf32, #tpu.memory_space<vmem>>, vector<8x32xf32>
    %cst = arith.constant dense<0.000000e+00> : vector<32x8xf32>
    %3 = tpu.matmul %0, %2, %cst {dimension_numbers = #tpu.dot_dimension_numbers<[1], [1], [0], [0], [0, 0, 1, 0], [], []>} : vector<32x32xf32>, vector<8x32xf32>, vector<32x8xf32> -> vector<32x8xf32>
    %4 = vector.broadcast %1 : vector<32x1xf32> to vector<32x8xf32>
    %5 = arith.addf %3, %4 : vector<32x8xf32>
    %c0_5 = arith.constant 0 : index
    %c0_6 = arith.constant 0 : index
    %6 = vector.load %arg2[%c0_5, %c0_6] : memref<8x32xf32, #tpu.memory_space<vmem>>, vector<8x32xf32>
    %cst_7 = arith.constant dense<0.000000e+00> : vector<32x8xf32>
    %7 = tpu.matmul %0, %6, %cst_7 {dimension_numbers = #tpu.dot_dimension_numbers<[1], [1], [0], [0], [0, 0, 1, 0], [], []>} : vector<32x32xf32>, vector<8x32xf32>, vector<32x8xf32> -> vector<32x8xf32>
    %8 = vector.broadcast %1 : vector<32x1xf32> to vector<32x8xf32>
    %9 = arith.addf %7, %8 : vector<32x8xf32>
    %10 = arith.mulf %5, %9 : vector<32x8xf32>
    %cst_8 = arith.constant dense<0.000000e+00> : vector<8xf32>
    %11 = vector.multi_reduction <add>, %10, %cst_8 [0] : vector<32x8xf32> to vector<8xf32>
    %12 = vector.shape_cast %11 : vector<8xf32> to vector<1x8xf32>
    %13 = arith.mulf %5, %5 : vector<32x8xf32>
    %cst_9 = arith.constant dense<0.000000e+00> : vector<8xf32>
    %14 = vector.multi_reduction <add>, %13, %cst_9 [0] : vector<32x8xf32> to vector<8xf32>
    %15 = vector.shape_cast %14 : vector<8xf32> to vector<1x8xf32>
    %16 = arith.mulf %9, %9 : vector<32x8xf32>
    %cst_10 = arith.constant dense<0.000000e+00> : vector<8xf32>
    %17 = vector.multi_reduction <add>, %16, %cst_10 [0] : vector<32x8xf32> to vector<8xf32>
    %18 = vector.shape_cast %17 : vector<8xf32> to vector<1x8xf32>
    %19 = arith.mulf %15, %18 : vector<1x8xf32>
    %cst_11 = arith.constant 1.000000e-16 : f32
    %20 = vector.broadcast %cst_11 : f32 to vector<1x8xf32>
    %21 = arith.maximumf %19, %20 : vector<1x8xf32>
    %22 = math.rsqrt %21 : vector<1x8xf32>
    %23 = arith.mulf %12, %22 : vector<1x8xf32>
    %24 = vector.shape_cast %23 : vector<1x8xf32> to vector<1x1x8xf32>
    %c0_12 = arith.constant 0 : index
    %c0_13 = arith.constant 0 : index
    %c0_14 = arith.constant 0 : index
    %25 = vector.load %arg5[%c0_12, %c0_13, %c0_14] : memref<1x1x8xf32, #tpu.memory_space<vmem>>, vector<1x1x8xf32>
    tpu.vector_store %arg5[%c0_12, %c0_13, %c0_14], %24 {strides = array<i32>} : memref<1x1x8xf32, #tpu.memory_space<vmem>>, vector<1x1x8xf32>,
    return
  }
  func.func @transform_0(%arg0: i32) -> (i32, i32) {
    %c0_i32 = arith.constant 0 : i32
    %c0_i32_0 = arith.constant 0 : i32
    return %arg0, %c0_i32 : i32, i32
  }
  func.func @transform_1(%arg0: i32) -> (i32, i32) {
    %c0_i32 = arith.constant 0 : i32
    %c0_i32_0 = arith.constant 0 : i32
    return %arg0, %c0_i32 : i32, i32
  }
  func.func @transform_2(%arg0: i32) -> (i32, i32) {
    %c0_i32 = arith.constant 0 : i32
    %c0_i32_0 = arith.constant 0 : i32
    %c0_i32_1 = arith.constant 0 : i32
    return %c0_i32, %c0_i32_0 : i32, i32
  }
  func.func @transform_3(%arg0: i32) -> (i32, i32) {
    %c0_i32 = arith.constant 0 : i32
    %c0_i32_0 = arith.constant 0 : i32
    %c0_i32_1 = arith.constant 0 : i32
    return %c0_i32, %c0_i32_0 : i32, i32
  }
  func.func @transform_4(%arg0: i32) -> (i32, i32, i32) {
    %c0_i32 = arith.constant 0 : i32
    %c0_i32_0 = arith.constant 0 : i32
    %c0_i32_1 = arith.constant 0 : i32
    return %arg0, %c0_i32, %c0_i32_0 : i32, i32, i32
  }
}

module attributes {stable_mosaic.version = 11 : i64} {
  func.func @decoder_kernel(%arg0: i32, %arg1: memref<8x32xf32, #tpu.memory_space<vmem>>, %arg2: memref<8x32xf32, #tpu.memory_space<vmem>>, %arg3: memref<32x32xf32, #tpu.memory_space<vmem>>, %arg4: memref<32x1xf32, #tpu.memory_space<vmem>>, %arg5: memref<1x1x8xf32, #tpu.memory_space<vmem>>) attributes {dimension_semantics = [#tpu.dimension_semantics<parallel>], iteration_bounds = array<i64: 2>, scalar_prefetch = 0 : i64, scratch_operands = 0 : i64, tpu.core_type = #tpu.core_type<tc>, window_params = [{transform_indices = @transform_0, window_bounds = array<i64: 8, 32>}, {transform_indices = @transform_1, window_bounds = array<i64: 8, 32>}, {pipeline_mode = #tpu.pipeline_mode<synchronous>, transform_indices = @transform_2, window_bounds = array<i64: 32, 32>}, {pipeline_mode = #tpu.pipeline_mode<synchronous>, transform_indices = @transform_3, window_bounds = array<i64: 32, 1>}, {transform_indices = @transform_4, window_bounds = array<i64: 1, 1, 8>}]} {
    %c0 = arith.constant 0 : index
    %c0_0 = arith.constant 0 : index
    %0 = vector.load %arg3[%c0, %c0_0] : memref<32x32xf32, #tpu.memory_space<vmem>>, vector<32x32xf32>
    %c0_1 = arith.constant 0 : index
    %c0_2 = arith.constant 0 : index
    %1 = vector.load %arg4[%c0_1, %c0_2] : memref<32x1xf32, #tpu.memory_space<vmem>>, vector<32x1xf32>
    %c0_3 = arith.constant 0 : index
    %c0_4 = arith.constant 0 : index
    %2 = vector.load %arg1[%c0_3, %c0_4] : memref<8x32xf32, #tpu.memory_space<vmem>>, vector<8x32xf32>
    %cst = arith.constant dense<0.000000e+00> : vector<32x8xf32>
    %3 = tpu.matmul %0, %2, %cst {dimension_numbers = #tpu.dot_dimension_numbers<[1], [1], [0], [0], [0, 0, 1, 0], [], []>} : vector<32x32xf32>, vector<8x32xf32>, vector<32x8xf32> -> vector<32x8xf32>
    %4 = vector.broadcast %1 : vector<32x1xf32> to vector<32x8xf32>
    %5 = arith.addf %3, %4 : vector<32x8xf32>
    %c0_5 = arith.constant 0 : index
    %c0_6 = arith.constant 0 : index
    %6 = vector.load %arg2[%c0_5, %c0_6] : memref<8x32xf32, #tpu.memory_space<vmem>>, vector<8x32xf32>
    %cst_7 = arith.constant dense<0.000000e+00> : vector<32x8xf32>
    %7 = tpu.matmul %0, %6, %cst_7 {dimension_numbers = #tpu.dot_dimension_numbers<[1], [1], [0], [0], [0, 0, 1, 0], [], []>} : vector<32x32xf32>, vector<8x32xf32>, vector<32x8xf32> -> vector<32x8xf32>
    %8 = vector.broadcast %1 : vector<32x1xf32> to vector<32x8xf32>
    %9 = arith.addf %7, %8 : vector<32x8xf32>
    %10 = arith.mulf %5, %9 : vector<32x8xf32>
    %cst_8 = arith.constant dense<0.000000e+00> : vector<8xf32>
    %11 = vector.multi_reduction <add>, %10, %cst_8 [0] : vector<32x8xf32> to vector<8xf32>
    %12 = vector.shape_cast %11 : vector<8xf32> to vector<1x8xf32>
    %13 = arith.mulf %5, %5 : vector<32x8xf32>
    %cst_9 = arith.constant dense<0.000000e+00> : vector<8xf32>
    %14 = vector.multi_reduction <add>, %13, %cst_9 [0] : vector<32x8xf32> to vector<8xf32>
    %15 = vector.shape_cast %14 : vector<8xf32> to vector<1x8xf32>
    %16 = arith.mulf %9, %9 : vector<32x8xf32>
    %cst_10 = arith.constant dense<0.000000e+00> : vector<8xf32>
    %17 = vector.multi_reduction <add>, %16, %cst_10 [0] : vector<32x8xf32> to vector<8xf32>
    %18 = vector.shape_cast %17 : vector<8xf32> to vector<1x8xf32>
    %19 = arith.mulf %15, %18 : vector<1x8xf32>
    %cst_11 = arith.constant 1.000000e-16 : f32
    %20 = vector.broadcast %cst_11 : f32 to vector<1x8xf32>
    %21 = arith.maximumf %19, %20 : vector<1x8xf32>
    %22 = math.rsqrt %21 : vector<1x8xf32>
    %23 = arith.mulf %12, %22 : vector<1x8xf32>
    %24 = vector.shape_cast %23 : vector<1x8xf32> to vector<1x1x8xf32>
    %c0_12 = arith.constant 0 : index
    %c0_13 = arith.constant 0 : index
    %c0_14 = arith.constant 0 : index
    %25 = vector.load %arg5[%c0_12, %c0_13, %c0_14] : memref<1x1x8xf32, #tpu.memory_space<vmem>>, vector<1x1x8xf32>
    tpu.vector_store %arg5[%c0_12, %c0_13, %c0_14], %24 {strides = array<i32>} : memref<1x1x8xf32, #tpu.memory_space<vmem>>, vector<1x1x8xf32>,
    return
  }
  func.func @transform_0(%arg0: i32) -> (i32, i32) {
    %c0_i32 = arith.constant 0 : i32
    %c0_i32_0 = arith.constant 0 : i32
    return %arg0, %c0_i32 : i32, i32
  }
  func.func @transform_1(%arg0: i32) -> (i32, i32) {
    %c0_i32 = arith.constant 0 : i32
    %c0_i32_0 = arith.constant 0 : i32
    return %arg0, %c0_i32 : i32, i32
  }
  func.func @transform_2(%arg0: i32) -> (i32, i32) {
    %c0_i32 = arith.constant 0 : i32
    %c0_i32_0 = arith.constant 0 : i32
    %c0_i32_1 = arith.constant 0 : i32
    return %c0_i32, %c0_i32_0 : i32, i32
  }
  func.func @transform_3(%arg0: i32) -> (i32, i32) {
    %c0_i32 = arith.constant 0 : i32
    %c0_i32_0 = arith.constant 0 : i32
    %c0_i32_1 = arith.constant 0 : i32
    return %c0_i32, %c0_i32_0 : i32, i32
  }
  func.func @transform_4(%arg0: i32) -> (i32, i32, i32) {
    %c0_i32 = arith.constant 0 : i32
    %c0_i32_0 = arith.constant 0 : i32
    %c0_i32_1 = arith.constant 0 : i32
    return %arg0, %c0_i32, %c0_i32_0 : i32, i32, i32
  }
}

</mosaic_0001>

<bundles_post_ra>
// kernel: tpu_custom_call.1
= control target key start
LH: loop header
LB: loop body
LE: loop exit
PB: predicated region body
PF: predicated region fallthrough
CT: control target
= control target key end

     0   :  { %9 = vsyncpa [#allocation3], 0  ;;  %s1131_s0 = inlined_call_operand.hbm [shape: f32[16,32], index: 0, kind: input, shape index: {}]   ;;  %s1132_s1 = inlined_call_operand.hbm [shape: f32[16,32], index: 1, kind: input, shape index: {}]   ;;  %s1133_s2 = inlined_call_operand.vmem [shape: f32[32,32], index: 2, kind: input, shape index: {}]   ;;  %s1134_s3 = inlined_call_operand.vmem [shape: f32[32,1], index: 3, kind: input, shape index: {}]   ;;  %s1135_s4 = inlined_call_operand.hbm [shape: f32[2,1,8], index: 4, kind: output, shape index: {}]  }
   0x1   :  { %11 = vsyncpa [#allocation3 + $0x1], 0 }
   0x2   :  { %12 = vsyncpa [#allocation6], 0 }
   0x3   :  { %14 = vsyncpa [#allocation6 + $0x1], 0 }
   0x4   :  { %15 = vsyncpa [#allocation4], 0 }
   0x5   :  { %17 = vsyncpa [#allocation4 + $0x1], 0  ;;  %s888_s15 = smov 0   ;;  %s890_s16 = smov 0  }
   0x6   :  { %s892_s17 = smov 0   ;;  %s894_s18 = smov 0  }
   0x7 LB: > { %s909_s19 = sadd.s32 4294967295, %s857_s18   ;;  %s628_s20 = sadd.s32 4294967294, %s857_s18   ;;  %s857_s18 = sphi %s894_s18, %s1154_s18   ;;  %s853_s17 = sphi %s892_s17, %s1153_s17   ;;  %s849_s16 = sphi %s890_s16, %s1152_s16   ;;  %s845_s15 = sphi %s888_s15, %s1151_s15  }
   0x8   : > { %s913_s21 = sadd.s32 1, %s857_s18   ;;  %s30_s22 = sadd.s32 1, %s853_s17 }
   0x9   : > { %s27_s23 = ssub.s32 %s857_s18, %s913_s21  ;;  %p37_p0 = scmp.ne.s32.totalorder %s853_s17, %s849_s16 }
   0xa   : > { %p28_p1 = scmp.eq.s32.totalorder %s27_s23, 0  ;;  %p38_p2 = scmp.eq.s32.totalorder %s857_s18, 0 }
   0xb   : > { %p43_p3 = scmp.ne.s32.totalorder %s849_s16, %s845_s15  ;;  %p44_p4 = scmp.eq.s32.totalorder %s909_s19, 0 }
   0xc   : > { %s925_s24 = scalar_select %p28_p1, %s853_s17, %s30_s22  }
   0xd   : > { %p927_p5 = por %p38_p2, %p37_p0  ;;  %p931_p6 = por %p44_p4, %p43_p3 }
   0xe   : > { %p135_p7 = scmp.eq.s32.totalorder %s909_s19, 1  ;;  %p141_p8 = scmp.eq.s32.totalorder %s628_s20, 1 }
   0xf   : > { %s1139_s26 = scalar_select %p931_p6, 1, 0 }
  0x10   : > { %p694_p10 = scmp.lt.s32.totalorder %s857_s18, 2  ;;  %p938_p11 = por %p135_p7, %p37_p0 }
  0x11   : > { %p942_p12 = por %p141_p8, %p43_p3  ;;  %s947_s29 = sand.u32 1, %s853_s17  }
  0x12   : > { %s1140_s27 = scalar_select %p938_p11, 1, 0 }
  0x13   : > { %s1141_s28 = scalar_select %p942_p12, 1, 0 }
  0x14   : > { %s632_s30 = sshll.u32 %s857_s18, 7  ;;  %s631_s5 = sshll.u32 %s947_s29, 3 }
  0x15   : > { %s956_s8 = scalar_lea.hbm %s1131_s0, %s632_s30  ;;  %s171_s9 = scalar_lea.vmem [#allocation2], %s631_s5 }
  0x16   : > { %s178_s10 = sshll.u32 %s171_s9, 4  ;;  %p962_p13 = pnand %p694_p10, %p927_p5  ;;  %s966_s10 = int_to_ptr.vmem [resolvable:$true] %s178_s10 }
  0x17   : > { %s168_s12 = scalar_lea.sflag [#allocation3], %s947_s29  ;;  %s733_s13 = scalar_lea.hbm %s956_s8, 128 }
  0x18   : > { %p734_p2 = scmp.ne.s32.totalorder %s956_s8, %s733_s13  ;;  %p735_p3 = pneg %p962_p13 }
  0x19   : > { %s738_s22 = scalar_lea.hbm %s1131_s0, 256  ;;  %p739_p5 = scmp.lt.s32.totalorder %s956_s8, %s1131_s0 }
  0x1a   : > { %p736_p4 = pnand %p735_p3, %p734_p2  ;;  %p740_p8 = scmp.lt.s32.totalorder %s738_s22, %s733_s13 }
  0x1c   : > { %p737_p7 = pneg %p736_p4  ;;  %p741_p10 = por %p740_p8, %p739_p5 }
  0x1e   : > { %p742_p9 = pnand %p741_p10, %p737_p7 }
  0x20   : > { %745 = shalt.err (!%p742_p9)
}
  0x21   : > { %s746_s6 = scalar_lea.vmem %s966_s10, 128  ;;  %s859_s7 = smov [#allocation2]  }
  0x22   : > { %p747_p0 = scmp.ne.s32.totalorder %s966_s10, %s746_s6  ;;  %s751_s9 = sshll.u32 %s859_s7, 4  ;;  %s752_s9 = int_to_ptr.vmem [resolvable:$false] %s751_s9 }
  0x23   : > { %s753_s14 = scalar_lea.vmem %s752_s9, 256  ;;  %p754_p1 = scmp.lt.s32.totalorder %s966_s10, %s752_s9 }
  0x24   : > { %p749_p2 = pnand %p747_p0, %p735_p3  ;;  %p755_p12 = scmp.lt.s32.totalorder %s753_s14, %s746_s6 }
  0x26   : > { %p750_p4 = pneg %p749_p2  ;;  %p756_p11 = por %p755_p12, %p754_p1 }
  0x28   : > { %p757_p5 = pnand %p756_p11, %p750_p4 }
  0x2a   : > { %760 = shalt.err (!%p757_p5)
}
  0x2b   : > { %686 = dma.hbm_to_vmem [thread:$0]  (!%p962_p13), %s956_s8, 128, %s966_s10, %s168_s12  }
  0x2c   : > { %p1143_p9 = scmp.lt.s32.totalorder %s857_s18, 3  ;;  %p1144_p0 = scmp.ge.s32.totalorder %s857_s18, 1 }
  0x2d   : > { %s1008_s23 = scalar_lea.hbm %s1132_s1, %s632_s30  ;;  %s189_s25 = scalar_lea.vmem [#allocation5], %s631_s5 }
  0x2e   : > { %p999_p7 = pnand %p1144_p0, %p1143_p9  ;;  %s196_s6 = sshll.u32 %s189_s25, 4  ;;  %s197_s6 = int_to_ptr.vmem [resolvable:$true] %s196_s6 }
  0x2f   : > { %s186_s8 = scalar_lea.sflag [#allocation6], %s947_s29  ;;  %s761_s10 = scalar_lea.hbm %s1008_s23, 128 }
  0x30   : > { %s1145_s13 = scalar_select %p999_p7, 1, 0 }
  0x31   : > { %p762_p11 = scmp.ne.s32.totalorder %s1008_s23, %s761_s10  ;;  %s766_s9 = scalar_lea.hbm %s1132_s1, 256 }
  0x32   : > { %p767_p8 = scmp.lt.s32.totalorder %s1008_s23, %s1132_s1  ;;  %p768_p10 = scmp.lt.s32.totalorder %s766_s9, %s761_s10 }
  0x33   : > { %p764_p12 = pnand %p762_p11, %p735_p3 }
  0x34   : > { %p769_p2 = por %p768_p10, %p767_p8 }
  0x35   : > { %p765_p1 = pneg %p764_p12 }
  0x37   : > { %p770_p4 = pnand %p769_p2, %p765_p1 }
  0x39   : > { %773 = shalt.err (!%p770_p4)
}
  0x3a   : > { %s774_s5 = scalar_lea.vmem %s197_s6, 128  ;;  %s860_s29 = smov [#allocation5]  }
  0x3b   : > { %p775_p5 = scmp.ne.s32.totalorder %s197_s6, %s774_s5  ;;  %s779_s20 = sshll.u32 %s860_s29, 4  ;;  %s780_s20 = int_to_ptr.vmem [resolvable:$false] %s779_s20 }
  0x3c   : > { %s781_s22 = scalar_lea.vmem %s780_s20, 256  ;;  %p782_p11 = scmp.lt.s32.totalorder %s197_s6, %s780_s20 }
  0x3d   : > { %p777_p9 = pnand %p775_p5, %p735_p3  ;;  %p783_p12 = scmp.lt.s32.totalorder %s781_s22, %s774_s5 }
  0x3f   : > { %p778_p0 = pneg %p777_p9  ;;  %p784_p6 = por %p783_p12, %p782_p11 }
  0x41   : > { %p785_p7 = pnand %p784_p6, %p778_p0 }
  0x43   : > { %788 = shalt.err (!%p785_p7)
}
  0x44   : > { %689 = dma.hbm_to_vmem [thread:$0]  (!%p962_p13), %s1008_s23, 128, %s197_s6, %s186_s8  }
  0x45   : > { %p1146_p1 = scmp.ne.s32.totalorder %s1145_s13, 0 }
  0x46   : > { %s1034_s25 = sand.u32 (!%p1146_p1), 1, %s849_s16   ;;  %p1147_p3 = scmp.ne.s32.totalorder (!%p1146_p1), %s1139_s26, 0 }
  0x47   : > { %205 = sbr.rel (%p1146_p1) target bundleno = 338 (0x152), region = 36  ;;  %s636_s10 = sshll.u32 (!%p1146_p1), %s1034_s25, 3 }
  0x48   : > { %s208_s12 = scalar_lea.sflag (!%p1146_p1), [#allocation3], %s1034_s25  ;;  %s211_s7 = scalar_lea.vmem (!%p1146_p1), [#allocation2], %s636_s10 }
  0x4c   : > { %832 = dma.done.wait (%p1147_p3), %s208_s12, 128  }
  0x4d   : > { %834 = vsyncadd (%p1147_p3), %s208_s12, 4294967168  ;;  %s217_s11 = scalar_lea.sflag [#allocation6], %s1034_s25  ;;  %s220_s23 = scalar_lea.vmem [#allocation5], %s636_s10 }
  0x4e   : > { %836 = dma.done.wait (%p1147_p3), %s217_s11, 128  }
  0x4f   : > { %838 = vsyncadd (%p1147_p3), %s217_s11, 4294967168  ;;  %v861_v0 = vmov 0   ;;  %vm278_vm0 = vcmask 261120   ;;  %v257_v1 = vld [vmem:[%s211_s7] sm:$0xff]  ;;  %v379_v2 = vld [vmem:[%s220_s23] sm:$0xff]  ;;  %vm472_vm1 = vcmask 64512  }
  0x50   : > { %729 = vset.pattern.permute.xlu0 %v861_v0  ;;  %730 = vset.pattern.permute.xlu1 %v861_v0  ;;  %v249_v3 = vld [vmem:[%s1133_s2] sm:$0xff]  ;;  %v250_v4 = vld [vmem:[%s1133_s2 + $0x8] sm:$0xff]  ;;  %v255_v6 = vld [vmem:[%s1134_s3 + $0x10] sm:$0xff]  ;;  %s648_s13 = sshll.u32 %s909_s19, 4  ;;  %s248_s6 = scalar_lea.vmem [#allocation7], %s1034_s25  ;;  %vm524_vm2 = vcmask 57344  }
  0x51   : > { %661 = vmatprep.subr.msk.mxu0 %vm278_vm0, %v257_v1  ;;  %669 = vmatprep.subr.msk.mxu1 %vm278_vm0, %v379_v2  ;;  %v253_v5 = vld [vmem:[%s1134_s3] sm:$0xff]  ;;  %v251_v7 = vld [vmem:[%s1133_s2 + $0x10] sm:$0xff]  ;;  %v254_v8 = vld [vmem:[%s1134_s3 + $0x8] sm:$0xff]  ;;  %s539_s26 = sshll.u32 %s248_s6, 4  ;;  %s537_s30 = scalar_lea.hbm %s1135_s4, %s648_s13  ;;  %s540_s26 = int_to_ptr.vmem [resolvable:$true] %s539_s26 }
  0x52   : > { %662 = vmatpush3.xpose.msk.msra.mxu0 %vm278_vm0, %v257_v1  ;;  %670 = vmatpush3.xpose.msk.msra.mxu1 %vm278_vm0, %v379_v2  ;;  %v256_v9 = vld [vmem:[%s1134_s3 + $0x18] sm:$0xff]  ;;  %s527_s14 = scalar_lea.sflag [#allocation4], %s1034_s25  ;;  %s789_s5 = scalar_lea.vmem %s540_s26, 16 }
  0x53   : > { %663 = vmatprep.mubr.msk.f32.mxu0 %vm278_vm0, %v249_v3  ;;  %671 = vmatprep.mubr.msk.f32.mxu1 %vm278_vm0, %v249_v3  ;;  %v252_v10 = vld [vmem:[%s1133_s2 + $0x18] sm:$0xff]  ;;  %p790_p6 = scmp.ne.s32.totalorder %s540_s26, %s789_s5  ;;  %p1148_p13 = scmp.ne.s32.totalorder %s1140_s27, 0 }
  0x54   : > { %260 = vperm.xlu0 %729, %v253_v5   ;;  %270 = vperm.xlu1 %730, %v255_v6   ;;  %s862_s29 = smov [#allocation7]  }
  0x55   : > { %664 = vmatmul.mubr.msk.f32.vlgmr.msra.gmra.mxu0 %vm278_vm0, %v250_v4  ;;  %672 = vmatmul.mubr.msk.f32.vlgmr.msra.gmra.mxu1 %vm278_vm0, %v250_v4  ;;  %p791_p7 = pnand %p790_p6, %p1148_p13  ;;  %s793_s19 = sshll.u32 %s862_s29, 4  ;;  %s794_s19 = int_to_ptr.vmem [resolvable:$false] %s793_s19 }
  0x56   : > { %666 = vmatprep.mubr.msk.f32.mxu0 %vm278_vm0, %v251_v7  ;;  %674 = vmatprep.mubr.msk.f32.mxu1 %vm278_vm0, %v251_v7  ;;  %s795_s20 = scalar_lea.vmem %s794_s19, 32  ;;  %p796_p10 = scmp.lt.s32.totalorder %s540_s26, %s794_s19 }
  0x57   : > { %p792_p8 = pneg %p791_p7  ;;  %p797_p2 = scmp.lt.s32.totalorder %s795_s20, %s789_s5 }
  0x58   : > { %265 = vperm.xlu0 %729, %v254_v8   ;;  %275 = vperm.xlu1 %730, %v256_v9  }
  0x59   : > { %667 = vmatmul.mubr.msk.f32.gmra.mxu0 %vm278_vm0, %v252_v10  ;;  %675 = vmatmul.mubr.msk.f32.gmra.mxu1 %vm278_vm0, %v252_v10  ;;  %p798_p4 = por %p797_p2, %p796_p10 }
  0x5b   : > { %p799_p5 = pnand %p798_p4, %p792_p8 }
  0xcf   : > { %v261_v11 = vpop.permute.xlu0 %260  ;;  %v271_v12 = vpop.permute.xlu1 %270 }
  0xd3   : > { %v266_v13 = vpop.permute.xlu0 %265  ;;  %v276_v21 = vpop.permute.xlu1 %275 }
 0x115   : > { %v665_v14 = vpop.f32.mrf.mxu0  ;;  %v673_v15 = vpop.f32.mrf.mxu1 }
 0x116   : > { %v366_v16 = vadd.f32 %v665_v14, %v266_v13  ;;  %v455_v17 = vadd.f32 %v673_v15, %v266_v13 }
 0x117   : > { %v360_v18 = vpop.f32.mrf.mxu0  ;;  %v449_v19 = vpop.f32.mrf.mxu1 }
 0x118   : > { %v361_v20 = vadd.f32 %v360_v18, %v261_v11  ;;  %v450_v22 = vadd.f32 %v449_v19, %v261_v11  ;;  %v487_v25 = vmul.f32 %v366_v16, %v366_v16  ;;  %v504_v26 = vmul.f32 %v455_v17, %v455_v17 }
 0x119   : > { %v668_v23 = vpop.f32.mrf.mxu0  ;;  %v676_v24 = vpop.f32.mrf.mxu1  ;;  %v469_v39 = vmul.f32 %v455_v17, %v366_v16 }
 0x11a   : > { %v486_v27 = vmul.f32 %v361_v20, %v361_v20  ;;  %v503_v28 = vmul.f32 %v450_v22, %v450_v22  ;;  %v376_v29 = vadd.f32 %v668_v23, %v276_v21  ;;  %v465_v30 = vadd.f32 %v676_v24, %v276_v21 }
 0x11b   : > { %v370_v31 = vpop.f32.mrf.mxu0  ;;  %v459_v32 = vpop.f32.mrf.mxu1  ;;  %v468_v36 = vmul.f32 %v450_v22, %v361_v20  ;;  %v491_v38 = vsel %vm472_vm1, %v487_v25, 0.0  ;;  %v508_v40 = vsel %vm472_vm1, %v504_v26, 0.0  ;;  %v474_v53 = vsel %vm472_vm1, %v469_v39, 0.0 }
 0x11c   : > { %v371_v33 = vadd.f32 %v370_v31, %v271_v12  ;;  %v460_v34 = vadd.f32 %v459_v32, %v271_v12  ;;  %v490_v35 = vsel %vm472_vm1, %v486_v27, 0.0  ;;  %v507_v37 = vsel %vm472_vm1, %v503_v28, 0.0 }
 0x11d   : > { %v489_v41 = vmul.f32 %v376_v29, %v376_v29  ;;  %v506_v42 = vmul.f32 %v465_v30, %v465_v30  ;;  %v492_v46 = vadd.f32 %v491_v38, %v490_v35  ;;  %v509_v47 = vadd.f32 %v508_v40, %v507_v37 }
 0x11e   : > { %v488_v43 = vmul.f32 %v371_v33, %v371_v33  ;;  %v470_v44 = vmul.f32 %v460_v34, %v371_v33  ;;  %v505_v45 = vmul.f32 %v460_v34, %v460_v34  ;;  %v473_v48 = vsel %vm472_vm1, %v468_v36, 0.0 }
 0x11f   : > { %v495_v54 = vsel %vm472_vm1, %v489_v41, 0.0  ;;  %v512_v55 = vsel %vm472_vm1, %v506_v42, 0.0  ;;  %v475_v57 = vadd.f32 %v474_v53, %v473_v48  ;;  %v471_v60 = vmul.f32 %v465_v30, %v376_v29 }
 0x120   : > { %v493_v49 = vsel %vm472_vm1, %v488_v43, 0.0  ;;  %v510_v50 = vsel %vm472_vm1, %v505_v45, 0.0  ;;  %v476_v56 = vsel %vm472_vm1, %v470_v44, 0.0 }
 0x121   : > { %v494_v51 = vadd.f32 %v493_v49, %v492_v46  ;;  %v511_v52 = vadd.f32 %v510_v50, %v509_v47  ;;  %v477_v62 = vadd.f32 %v476_v56, %v475_v57  ;;  %v478_v2 = vsel %vm472_vm1, %v471_v60, 0.0 }
 0x123   : > { %v496_v58 = vadd.f32 %v495_v54, %v494_v51  ;;  %v513_v59 = vadd.f32 %v512_v55, %v511_v52  ;;  %v479_v4 = vadd.f32 %v478_v2, %v477_v62 }
 0x125   : > { %v497_v61 = vrot.slane %v496_v58, 4  ;;  %v514_v63 = vrot.slane %v513_v59, 4  ;;  %v480_v9 = vrot.slane %v479_v4, 4 }
 0x127   : > { %v498_v0 = vadd.f32 %v497_v61, %v496_v58  ;;  %v515_v1 = vadd.f32 %v514_v63, %v513_v59  ;;  %v481_v13 = vadd.f32 %v480_v9, %v479_v4 }
 0x129   : > { %v499_v3 = vrot.slane %v498_v0, 2  ;;  %v516_v5 = vrot.slane %v515_v1, 2  ;;  %v482_v16 = vrot.slane %v481_v13, 2 }
 0x12b   : > { %v500_v6 = vadd.f32 %v499_v3, %v498_v0  ;;  %v517_v7 = vadd.f32 %v516_v5, %v515_v1  ;;  %v483_v17 = vadd.f32 %v482_v16, %v481_v13 }
 0x12d   : > { %v501_v8 = vrot.slane %v500_v6, 1  ;;  %v518_v10 = vrot.slane %v517_v7, 1  ;;  %v484_v18 = vrot.slane %v483_v17, 1 }
 0x12f   : > { %v502_v11 = vadd.f32 %v501_v8, %v500_v6  ;;  %v519_v12 = vadd.f32 %v518_v10, %v517_v7  ;;  %v485_v19 = vadd.f32 %v484_v18, %v483_v17 }
 0x131   : > { %v520_v14 = vmul.f32 %v519_v12, %v502_v11 }
 0x133   : > { %v521_v15 = vmax.f32 %v520_v14, 1e-16 }
 0x135   : > { %731 = vrsqrt.f32 %v521_v15 }
 0x142   : > { %v732_v20 = vpop.eup %731 }
 0x143   : > { %v523_v21 = vmul.f32 %v732_v20, %v485_v19 }
 0x145   : > { %525 = vst.msk [vmem:[%s248_s6] sm:$0x1] %vm524_vm2, %v523_v21 }
 0x146   : > { %802 = shalt.err (!%p799_p5)
}
 0x147   : > { %s803_s22 = scalar_lea.hbm %s537_s30, 16  ;;  %s807_s12 = scalar_lea.hbm %s1135_s4, 32 }
 0x148   : > { %p804_p9 = scmp.ne.s32.totalorder %s537_s30, %s803_s22  ;;  %p808_p12 = scmp.lt.s32.totalorder %s537_s30, %s1135_s4 }
 0x149   : > { %p809_p1 = scmp.lt.s32.totalorder %s807_s12, %s803_s22 }
 0x14a   : > { %p805_p0 = pnand %p804_p9, %p1148_p13 }
 0x14b   : > { %p810_p3 = por %p809_p1, %p808_p12 }
 0x14c   : > { %p806_p11 = pneg %p805_p0 }
 0x14e   : > { %p811_p6 = pnand %p810_p3, %p806_p11 }
 0x150   : > { %814 = shalt.err (!%p811_p6)
}
 0x151   : > { %681 = dma.vmem_to_hbm [thread:$0]  (%p1148_p13), %s540_s26, 16, %s537_s30, %s527_s14  }
 0x152 PF: > { %s551_s23 = sand.u32 1, %s845_s15   ;;  %p1149_p7 = scmp.ne.s32.totalorder %s1141_s28, 0 }
 0x153   : > { %p1150_p8 = scmp.ge.s32.totalorder %s857_s18, 2  ;;  %s552_s13 = scalar_lea.sflag [#allocation4], %s551_s23 }
 0x155   : > { %p691_p10 = pnand %p1150_p8, %p1149_p7 }
 0x157   : > { %p692_p2 = pneg %p691_p10 }
 0x159   : > { %840 = dma.done.wait (%p692_p2), %s552_s13, 16  }
 0x15a   : > { %842 = vsyncadd (%p692_p2), %s552_s13, 4294967280  ;;  %p20_p4 = scmp.ge.s32.totalorder %s913_s21, 4   ;;  %s1151_s15 = smov %s849_s16 }
 0x15b   : > { %s1152_s16 = smov %s853_s17  ;;  %s1153_s17 = smov %s925_s24 }
 0x15c   : > { %s1154_s18 = smov %s913_s21  ;;  %22 = sbr.rel (!%p20_p4) target bundleno = 7 (0x7), region = 94 }
 0x161   :  { %556 = vsyncpa [#allocation3], 1 }
 0x162   :  { %558 = vsyncpa [#allocation3 + $0x1], 1 }
 0x163   :  { %559 = vsyncpa [#allocation6], 1 }
 0x164   :  { %561 = vsyncpa [#allocation6 + $0x1], 1 }
 0x165   :  { %562 = vsyncpa [#allocation4], 1 }
 0x166   :  { %564 = vsyncpa [#allocation4 + $0x1], 1 }

// kernel: tpu_custom_call.1
= control target key start
LH: loop header
LB: loop body
LE: loop exit
PB: predicated region body
PF: predicated region fallthrough
CT: control target
= control target key end

     0   :  { %9 = vsyncpa [#allocation3], 0  ;;  %s1131_s0 = inlined_call_operand.hbm [shape: f32[16,32], index: 0, kind: input, shape index: {}]   ;;  %s1132_s1 = inlined_call_operand.hbm [shape: f32[16,32], index: 1, kind: input, shape index: {}]   ;;  %s1133_s2 = inlined_call_operand.vmem [shape: f32[32,32], index: 2, kind: input, shape index: {}]   ;;  %s1134_s3 = inlined_call_operand.vmem [shape: f32[32,1], index: 3, kind: input, shape index: {}]   ;;  %s1135_s4 = inlined_call_operand.hbm [shape: f32[2,1,8], index: 4, kind: output, shape index: {}]  }
   0x1   :  { %11 = vsyncpa [#allocation3 + $0x1], 0 }
   0x2   :  { %12 = vsyncpa [#allocation6], 0 }
   0x3   :  { %14 = vsyncpa [#allocation6 + $0x1], 0 }
   0x4   :  { %15 = vsyncpa [#allocation4], 0 }
   0x5   :  { %17 = vsyncpa [#allocation4 + $0x1], 0  ;;  %s888_s15 = smov 0   ;;  %s890_s16 = smov 0  }
   0x6   :  { %s892_s17 = smov 0   ;;  %s894_s18 = smov 0  }
   0x7 LB: > { %s909_s19 = sadd.s32 4294967295, %s857_s18   ;;  %s628_s20 = sadd.s32 4294967294, %s857_s18   ;;  %s857_s18 = sphi %s894_s18, %s1154_s18   ;;  %s853_s17 = sphi %s892_s17, %s1153_s17   ;;  %s849_s16 = sphi %s890_s16, %s1152_s16   ;;  %s845_s15 = sphi %s888_s15, %s1151_s15  }
   0x8   : > { %s913_s21 = sadd.s32 1, %s857_s18   ;;  %s30_s22 = sadd.s32 1, %s853_s17 }
   0x9   : > { %s27_s23 = ssub.s32 %s857_s18, %s913_s21  ;;  %p37_p0 = scmp.ne.s32.totalorder %s853_s17, %s849_s16 }
   0xa   : > { %p28_p1 = scmp.eq.s32.totalorder %s27_s23, 0  ;;  %p38_p2 = scmp.eq.s32.totalorder %s857_s18, 0 }
   0xb   : > { %p43_p3 = scmp.ne.s32.totalorder %s849_s16, %s845_s15  ;;  %p44_p4 = scmp.eq.s32.totalorder %s909_s19, 0 }
   0xc   : > { %s925_s24 = scalar_select %p28_p1, %s853_s17, %s30_s22  }
   0xd   : > { %p927_p5 = por %p38_p2, %p37_p0  ;;  %p931_p6 = por %p44_p4, %p43_p3 }
   0xe   : > { %p135_p7 = scmp.eq.s32.totalorder %s909_s19, 1  ;;  %p141_p8 = scmp.eq.s32.totalorder %s628_s20, 1 }
   0xf   : > { %s1139_s26 = scalar_select %p931_p6, 1, 0 }
  0x10   : > { %p694_p10 = scmp.lt.s32.totalorder %s857_s18, 2  ;;  %p938_p11 = por %p135_p7, %p37_p0 }
  0x11   : > { %p942_p12 = por %p141_p8, %p43_p3  ;;  %s947_s29 = sand.u32 1, %s853_s17  }
  0x12   : > { %s1140_s27 = scalar_select %p938_p11, 1, 0 }
  0x13   : > { %s1141_s28 = scalar_select %p942_p12, 1, 0 }
  0x14   : > { %s632_s30 = sshll.u32 %s857_s18, 7  ;;  %s631_s5 = sshll.u32 %s947_s29, 3 }
  0x15   : > { %s956_s8 = scalar_lea.hbm %s1131_s0, %s632_s30  ;;  %s171_s9 = scalar_lea.vmem [#allocation2], %s631_s5 }
  0x16   : > { %s178_s10 = sshll.u32 %s171_s9, 4  ;;  %p962_p13 = pnand %p694_p10, %p927_p5  ;;  %s966_s10 = int_to_ptr.vmem [resolvable:$true] %s178_s10 }
  0x17   : > { %s168_s12 = scalar_lea.sflag [#allocation3], %s947_s29  ;;  %s733_s13 = scalar_lea.hbm %s956_s8, 128 }
  0x18   : > { %p734_p2 = scmp.ne.s32.totalorder %s956_s8, %s733_s13  ;;  %p735_p3 = pneg %p962_p13 }
  0x19   : > { %s738_s22 = scalar_lea.hbm %s1131_s0, 256  ;;  %p739_p5 = scmp.lt.s32.totalorder %s956_s8, %s1131_s0 }
  0x1a   : > { %p736_p4 = pnand %p735_p3, %p734_p2  ;;  %p740_p8 = scmp.lt.s32.totalorder %s738_s22, %s733_s13 }
  0x1c   : > { %p737_p7 = pneg %p736_p4  ;;  %p741_p10 = por %p740_p8, %p739_p5 }
  0x1e   : > { %p742_p9 = pnand %p741_p10, %p737_p7 }
  0x20   : > { %745 = shalt.err (!%p742_p9)
}
  0x21   : > { %s746_s6 = scalar_lea.vmem %s966_s10, 128  ;;  %s859_s7 = smov [#allocation2]  }
  0x22   : > { %p747_p0 = scmp.ne.s32.totalorder %s966_s10, %s746_s6  ;;  %s751_s9 = sshll.u32 %s859_s7, 4  ;;  %s752_s9 = int_to_ptr.vmem [resolvable:$false] %s751_s9 }
  0x23   : > { %s753_s14 = scalar_lea.vmem %s752_s9, 256  ;;  %p754_p1 = scmp.lt.s32.totalorder %s966_s10, %s752_s9 }
  0x24   : > { %p749_p2 = pnand %p747_p0, %p735_p3  ;;  %p755_p12 = scmp.lt.s32.totalorder %s753_s14, %s746_s6 }
  0x26   : > { %p750_p4 = pneg %p749_p2  ;;  %p756_p11 = por %p755_p12, %p754_p1 }
  0x28   : > { %p757_p5 = pnand %p756_p11, %p750_p4 }
  0x2a   : > { %760 = shalt.err (!%p757_p5)
}
  0x2b   : > { %686 = dma.hbm_to_vmem [thread:$0]  (!%p962_p13), %s956_s8, 128, %s966_s10, %s168_s12  }
  0x2c   : > { %p1143_p9 = scmp.lt.s32.totalorder %s857_s18, 3  ;;  %p1144_p0 = scmp.ge.s32.totalorder %s857_s18, 1 }
  0x2d   : > { %s1008_s23 = scalar_lea.hbm %s1132_s1, %s632_s30  ;;  %s189_s25 = scalar_lea.vmem [#allocation5], %s631_s5 }
  0x2e   : > { %p999_p7 = pnand %p1144_p0, %p1143_p9  ;;  %s196_s6 = sshll.u32 %s189_s25, 4  ;;  %s197_s6 = int_to_ptr.vmem [resolvable:$true] %s196_s6 }
  0x2f   : > { %s186_s8 = scalar_lea.sflag [#allocation6], %s947_s29  ;;  %s761_s10 = scalar_lea.hbm %s1008_s23, 128 }
  0x30   : > { %s1145_s13 = scalar_select %p999_p7, 1, 0 }
  0x31   : > { %p762_p11 = scmp.ne.s32.totalorder %s1008_s23, %s761_s10  ;;  %s766_s9 = scalar_lea.hbm %s1132_s1, 256 }
  0x32   : > { %p767_p8 = scmp.lt.s32.totalorder %s1008_s23, %s1132_s1  ;;  %p768_p10 = scmp.lt.s32.totalorder %s766_s9, %s761_s10 }
  0x33   : > { %p764_p12 = pnand %p762_p11, %p735_p3 }
  0x34   : > { %p769_p2 = por %p768_p10, %p767_p8 }
  0x35   : > { %p765_p1 = pneg %p764_p12 }
  0x37   : > { %p770_p4 = pnand %p769_p2, %p765_p1 }
  0x39   : > { %773 = shalt.err (!%p770_p4)
}
  0x3a   : > { %s774_s5 = scalar_lea.vmem %s197_s6, 128  ;;  %s860_s29 = smov [#allocation5]  }
  0x3b   : > { %p775_p5 = scmp.ne.s32.totalorder %s197_s6, %s774_s5  ;;  %s779_s20 = sshll.u32 %s860_s29, 4  ;;  %s780_s20 = int_to_ptr.vmem [resolvable:$false] %s779_s20 }
  0x3c   : > { %s781_s22 = scalar_lea.vmem %s780_s20, 256  ;;  %p782_p11 = scmp.lt.s32.totalorder %s197_s6, %s780_s20 }
  0x3d   : > { %p777_p9 = pnand %p775_p5, %p735_p3  ;;  %p783_p12 = scmp.lt.s32.totalorder %s781_s22, %s774_s5 }
  0x3f   : > { %p778_p0 = pneg %p777_p9  ;;  %p784_p6 = por %p783_p12, %p782_p11 }
  0x41   : > { %p785_p7 = pnand %p784_p6, %p778_p0 }
  0x43   : > { %788 = shalt.err (!%p785_p7)
}
  0x44   : > { %689 = dma.hbm_to_vmem [thread:$0]  (!%p962_p13), %s1008_s23, 128, %s197_s6, %s186_s8  }
  0x45   : > { %p1146_p1 = scmp.ne.s32.totalorder %s1145_s13, 0 }
  0x46   : > { %s1034_s25 = sand.u32 (!%p1146_p1), 1, %s849_s16   ;;  %p1147_p3 = scmp.ne.s32.totalorder (!%p1146_p1), %s1139_s26, 0 }
  0x47   : > { %205 = sbr.rel (%p1146_p1) target bundleno = 338 (0x152), region = 36  ;;  %s636_s10 = sshll.u32 (!%p1146_p1), %s1034_s25, 3 }
  0x48   : > { %s208_s12 = scalar_lea.sflag (!%p1146_p1), [#allocation3], %s1034_s25  ;;  %s211_s7 = scalar_lea.vmem (!%p1146_p1), [#allocation2], %s636_s10 }
  0x4c   : > { %832 = dma.done.wait (%p1147_p3), %s208_s12, 128  }
  0x4d   : > { %834 = vsyncadd (%p1147_p3), %s208_s12, 4294967168  ;;  %s217_s11 = scalar_lea.sflag [#allocation6], %s1034_s25  ;;  %s220_s23 = scalar_lea.vmem [#allocation5], %s636_s10 }
  0x4e   : > { %836 = dma.done.wait (%p1147_p3), %s217_s11, 128  }
  0x4f   : > { %838 = vsyncadd (%p1147_p3), %s217_s11, 4294967168  ;;  %v861_v0 = vmov 0   ;;  %vm278_vm0 = vcmask 261120   ;;  %v257_v1 = vld [vmem:[%s211_s7] sm:$0xff]  ;;  %v379_v2 = vld [vmem:[%s220_s23] sm:$0xff]  ;;  %vm472_vm1 = vcmask 64512  }
  0x50   : > { %729 = vset.pattern.permute.xlu0 %v861_v0  ;;  %730 = vset.pattern.permute.xlu1 %v861_v0  ;;  %v249_v3 = vld [vmem:[%s1133_s2] sm:$0xff]  ;;  %v250_v4 = vld [vmem:[%s1133_s2 + $0x8] sm:$0xff]  ;;  %v255_v6 = vld [vmem:[%s1134_s3 + $0x10] sm:$0xff]  ;;  %s648_s13 = sshll.u32 %s909_s19, 4  ;;  %s248_s6 = scalar_lea.vmem [#allocation7], %s1034_s25  ;;  %vm524_vm2 = vcmask 57344  }
  0x51   : > { %661 = vmatprep.subr.msk.mxu0 %vm278_vm0, %v257_v1  ;;  %669 = vmatprep.subr.msk.mxu1 %vm278_vm0, %v379_v2  ;;  %v253_v5 = vld [vmem:[%s1134_s3] sm:$0xff]  ;;  %v251_v7 = vld [vmem:[%s1133_s2 + $0x10] sm:$0xff]  ;;  %v254_v8 = vld [vmem:[%s1134_s3 + $0x8] sm:$0xff]  ;;  %s539_s26 = sshll.u32 %s248_s6, 4  ;;  %s537_s30 = scalar_lea.hbm %s1135_s4, %s648_s13  ;;  %s540_s26 = int_to_ptr.vmem [resolvable:$true] %s539_s26 }
  0x52   : > { %662 = vmatpush3.xpose.msk.msra.mxu0 %vm278_vm0, %v257_v1  ;;  %670 = vmatpush3.xpose.msk.msra.mxu1 %vm278_vm0, %v379_v2  ;;  %v256_v9 = vld [vmem:[%s1134_s3 + $0x18] sm:$0xff]  ;;  %s527_s14 = scalar_lea.sflag [#allocation4], %s1034_s25  ;;  %s789_s5 = scalar_lea.vmem %s540_s26, 16 }
  0x53   : > { %663 = vmatprep.mubr.msk.f32.mxu0 %vm278_vm0, %v249_v3  ;;  %671 = vmatprep.mubr.msk.f32.mxu1 %vm278_vm0, %v249_v3  ;;  %v252_v10 = vld [vmem:[%s1133_s2 + $0x18] sm:$0xff]  ;;  %p790_p6 = scmp.ne.s32.totalorder %s540_s26, %s789_s5  ;;  %p1148_p13 = scmp.ne.s32.totalorder %s1140_s27, 0 }
  0x54   : > { %260 = vperm.xlu0 %729, %v253_v5   ;;  %270 = vperm.xlu1 %730, %v255_v6   ;;  %s862_s29 = smov [#allocation7]  }
  0x55   : > { %664 = vmatmul.mubr.msk.f32.vlgmr.msra.gmra.mxu0 %vm278_vm0, %v250_v4  ;;  %672 = vmatmul.mubr.msk.f32.vlgmr.msra.gmra.mxu1 %vm278_vm0, %v250_v4  ;;  %p791_p7 = pnand %p790_p6, %p1148_p13  ;;  %s793_s19 = sshll.u32 %s862_s29, 4  ;;  %s794_s19 = int_to_ptr.vmem [resolvable:$false] %s793_s19 }
  0x56   : > { %666 = vmatprep.mubr.msk.f32.mxu0 %vm278_vm0, %v251_v7  ;;  %674 = vmatprep.mubr.msk.f32.mxu1 %vm278_vm0, %v251_v7  ;;  %s795_s20 = scalar_lea.vmem %s794_s19, 32  ;;  %p796_p10 = scmp.lt.s32.totalorder %s540_s26, %s794_s19 }
  0x57   : > { %p792_p8 = pneg %p791_p7  ;;  %p797_p2 = scmp.lt.s32.totalorder %s795_s20, %s789_s5 }
  0x58   : > { %265 = vperm.xlu0 %729, %v254_v8   ;;  %275 = vperm.xlu1 %730, %v256_v9  }
  0x59   : > { %667 = vmatmul.mubr.msk.f32.gmra.mxu0 %vm278_vm0, %v252_v10  ;;  %675 = vmatmul.mubr.msk.f32.gmra.mxu1 %vm278_vm0, %v252_v10  ;;  %p798_p4 = por %p797_p2, %p796_p10 }
  0x5b   : > { %p799_p5 = pnand %p798_p4, %p792_p8 }
  0xcf   : > { %v261_v11 = vpop.permute.xlu0 %260  ;;  %v271_v12 = vpop.permute.xlu1 %270 }
  0xd3   : > { %v266_v13 = vpop.permute.xlu0 %265  ;;  %v276_v21 = vpop.permute.xlu1 %275 }
 0x115   : > { %v665_v14 = vpop.f32.mrf.mxu0  ;;  %v673_v15 = vpop.f32.mrf.mxu1 }
 0x116   : > { %v366_v16 = vadd.f32 %v665_v14, %v266_v13  ;;  %v455_v17 = vadd.f32 %v673_v15, %v266_v13 }
 0x117   : > { %v360_v18 = vpop.f32.mrf.mxu0  ;;  %v449_v19 = vpop.f32.mrf.mxu1 }
 0x118   : > { %v361_v20 = vadd.f32 %v360_v18, %v261_v11  ;;  %v450_v22 = vadd.f32 %v449_v19, %v261_v11  ;;  %v487_v25 = vmul.f32 %v366_v16, %v366_v16  ;;  %v504_v26 = vmul.f32 %v455_v17, %v455_v17 }
 0x119   : > { %v668_v23 = vpop.f32.mrf.mxu0  ;;  %v676_v24 = vpop.f32.mrf.mxu1  ;;  %v469_v39 = vmul.f32 %v455_v17, %v366_v16 }
 0x11a   : > { %v486_v27 = vmul.f32 %v361_v20, %v361_v20  ;;  %v503_v28 = vmul.f32 %v450_v22, %v450_v22  ;;  %v376_v29 = vadd.f32 %v668_v23, %v276_v21  ;;  %v465_v30 = vadd.f32 %v676_v24, %v276_v21 }
 0x11b   : > { %v370_v31 = vpop.f32.mrf.mxu0  ;;  %v459_v32 = vpop.f32.mrf.mxu1  ;;  %v468_v36 = vmul.f32 %v450_v22, %v361_v20  ;;  %v491_v38 = vsel %vm472_vm1, %v487_v25, 0.0  ;;  %v508_v40 = vsel %vm472_vm1, %v504_v26, 0.0  ;;  %v474_v53 = vsel %vm472_vm1, %v469_v39, 0.0 }
 0x11c   : > { %v371_v33 = vadd.f32 %v370_v31, %v271_v12  ;;  %v460_v34 = vadd.f32 %v459_v32, %v271_v12  ;;  %v490_v35 = vsel %vm472_vm1, %v486_v27, 0.0  ;;  %v507_v37 = vsel %vm472_vm1, %v503_v28, 0.0 }
 0x11d   : > { %v489_v41 = vmul.f32 %v376_v29, %v376_v29  ;;  %v506_v42 = vmul.f32 %v465_v30, %v465_v30  ;;  %v492_v46 = vadd.f32 %v491_v38, %v490_v35  ;;  %v509_v47 = vadd.f32 %v508_v40, %v507_v37 }
 0x11e   : > { %v488_v43 = vmul.f32 %v371_v33, %v371_v33  ;;  %v470_v44 = vmul.f32 %v460_v34, %v371_v33  ;;  %v505_v45 = vmul.f32 %v460_v34, %v460_v34  ;;  %v473_v48 = vsel %vm472_vm1, %v468_v36, 0.0 }
 0x11f   : > { %v495_v54 = vsel %vm472_vm1, %v489_v41, 0.0  ;;  %v512_v55 = vsel %vm472_vm1, %v506_v42, 0.0  ;;  %v475_v57 = vadd.f32 %v474_v53, %v473_v48  ;;  %v471_v60 = vmul.f32 %v465_v30, %v376_v29 }
 0x120   : > { %v493_v49 = vsel %vm472_vm1, %v488_v43, 0.0  ;;  %v510_v50 = vsel %vm472_vm1, %v505_v45, 0.0  ;;  %v476_v56 = vsel %vm472_vm1, %v470_v44, 0.0 }
 0x121   : > { %v494_v51 = vadd.f32 %v493_v49, %v492_v46  ;;  %v511_v52 = vadd.f32 %v510_v50, %v509_v47  ;;  %v477_v62 = vadd.f32 %v476_v56, %v475_v57  ;;  %v478_v2 = vsel %vm472_vm1, %v471_v60, 0.0 }
 0x123   : > { %v496_v58 = vadd.f32 %v495_v54, %v494_v51  ;;  %v513_v59 = vadd.f32 %v512_v55, %v511_v52  ;;  %v479_v4 = vadd.f32 %v478_v2, %v477_v62 }
 0x125   : > { %v497_v61 = vrot.slane %v496_v58, 4  ;;  %v514_v63 = vrot.slane %v513_v59, 4  ;;  %v480_v9 = vrot.slane %v479_v4, 4 }
 0x127   : > { %v498_v0 = vadd.f32 %v497_v61, %v496_v58  ;;  %v515_v1 = vadd.f32 %v514_v63, %v513_v59  ;;  %v481_v13 = vadd.f32 %v480_v9, %v479_v4 }
 0x129   : > { %v499_v3 = vrot.slane %v498_v0, 2  ;;  %v516_v5 = vrot.slane %v515_v1, 2  ;;  %v482_v16 = vrot.slane %v481_v13, 2 }
 0x12b   : > { %v500_v6 = vadd.f32 %v499_v3, %v498_v0  ;;  %v517_v7 = vadd.f32 %v516_v5, %v515_v1  ;;  %v483_v17 = vadd.f32 %v482_v16, %v481_v13 }
 0x12d   : > { %v501_v8 = vrot.slane %v500_v6, 1  ;;  %v518_v10 = vrot.slane %v517_v7, 1  ;;  %v484_v18 = vrot.slane %v483_v17, 1 }
 0x12f   : > { %v502_v11 = vadd.f32 %v501_v8, %v500_v6  ;;  %v519_v12 = vadd.f32 %v518_v10, %v517_v7  ;;  %v485_v19 = vadd.f32 %v484_v18, %v483_v17 }
 0x131   : > { %v520_v14 = vmul.f32 %v519_v12, %v502_v11 }
 0x133   : > { %v521_v15 = vmax.f32 %v520_v14, 1e-16 }
 0x135   : > { %731 = vrsqrt.f32 %v521_v15 }
 0x142   : > { %v732_v20 = vpop.eup %731 }
 0x143   : > { %v523_v21 = vmul.f32 %v732_v20, %v485_v19 }
 0x145   : > { %525 = vst.msk [vmem:[%s248_s6] sm:$0x1] %vm524_vm2, %v523_v21 }
 0x146   : > { %802 = shalt.err (!%p799_p5)
}
 0x147   : > { %s803_s22 = scalar_lea.hbm %s537_s30, 16  ;;  %s807_s12 = scalar_lea.hbm %s1135_s4, 32 }
 0x148   : > { %p804_p9 = scmp.ne.s32.totalorder %s537_s30, %s803_s22  ;;  %p808_p12 = scmp.lt.s32.totalorder %s537_s30, %s1135_s4 }
 0x149   : > { %p809_p1 = scmp.lt.s32.totalorder %s807_s12, %s803_s22 }
 0x14a   : > { %p805_p0 = pnand %p804_p9, %p1148_p13 }
 0x14b   : > { %p810_p3 = por %p809_p1, %p808_p12 }
 0x14c   : > { %p806_p11 = pneg %p805_p0 }
 0x14e   : > { %p811_p6 = pnand %p810_p3, %p806_p11 }
 0x150   : > { %814 = shalt.err (!%p811_p6)
}
 0x151   : > { %681 = dma.vmem_to_hbm [thread:$0]  (%p1148_p13), %s540_s26, 16, %s537_s30, %s527_s14  }
 0x152 PF: > { %s551_s23 = sand.u32 1, %s845_s15   ;;  %p1149_p7 = scmp.ne.s32.totalorder %s1141_s28, 0 }
 0x153   : > { %p1150_p8 = scmp.ge.s32.totalorder %s857_s18, 2  ;;  %s552_s13 = scalar_lea.sflag [#allocation4], %s551_s23 }
 0x155   : > { %p691_p10 = pnand %p1150_p8, %p1149_p7 }
 0x157   : > { %p692_p2 = pneg %p691_p10 }
 0x159   : > { %840 = dma.done.wait (%p692_p2), %s552_s13, 16  }
 0x15a   : > { %842 = vsyncadd (%p692_p2), %s552_s13, 4294967280  ;;  %p20_p4 = scmp.ge.s32.totalorder %s913_s21, 4   ;;  %s1151_s15 = smov %s849_s16 }
 0x15b   : > { %s1152_s16 = smov %s853_s17  ;;  %s1153_s17 = smov %s925_s24 }
 0x15c   : > { %s1154_s18 = smov %s913_s21  ;;  %22 = sbr.rel (!%p20_p4) target bundleno = 7 (0x7), region = 94 }
 0x161   :  { %556 = vsyncpa [#allocation3], 1 }
 0x162   :  { %558 = vsyncpa [#allocation3 + $0x1], 1 }
 0x163   :  { %559 = vsyncpa [#allocation6], 1 }
 0x164   :  { %561 = vsyncpa [#allocation6 + $0x1], 1 }
 0x165   :  { %562 = vsyncpa [#allocation4], 1 }
 0x166   :  { %564 = vsyncpa [#allocation4 + $0x1], 1 }

</bundles_post_ra>
